<compile_context>
chip_gen: v5e
topology: v5e:2x2
jax: 0.10.0
libtpu: 0.0.40
codegen_flags: <defaults>
</compile_context>

<pallas_src>
import jax
import jax.numpy as jnp
from jax.experimental import pallas as pl
from jax.experimental.pallas import tpu as pltpu

EPS = 1e-5


def adain_kernel(x_ref, sb_ref, o_ref):
    # x_ref:  (ROW_TILE, HW)  rows are (n, c) pairs, HW on the lane axis
    # sb_ref: (ROW_TILE, 2)   packed [style_scale, style_bias] per row (f32)
    x = x_ref[...].astype(jnp.float32)                       # (R, HW)
    sb = sb_ref[...]                                         # (R, 2)
    scale = sb[:, 0:1]                                       # (R, 1)
    bias = sb[:, 1:2]                                        # (R, 1)

    # Per-row mean / biased variance over the spatial extent in one sweep:
    # var = E[x^2] - mean^2 (no full-block centered temporary).
    mean = jnp.mean(x, axis=-1, keepdims=True)               # (R, 1)
    mean_sq = jnp.mean(x * x, axis=-1, keepdims=True)        # (R, 1)
    var = jnp.maximum(mean_sq - mean * mean, 0.0)            # guard cancellation

    # Fold normalization + affine into a single mul+add per element.
    a = scale * jax.lax.rsqrt(var + EPS)                     # (R, 1)
    b = bias - a * mean                                      # (R, 1)
    o_ref[...] = (a * x + b).astype(o_ref.dtype)


def _vmem_limit_bytes():
    """Per-generation VMEM limit: ~3/4 of physical, consistent with tiling."""
    try:
        phys = pltpu.get_tpu_info().vmem_capacity_bytes
    except Exception:
        phys = 64 * 1024 * 1024  # conservative fallback (v7x per-TC VMEM)
    # 128 MiB parts (v5e/v6e) -> 96 MiB; v7x's 64 MiB -> 48 MiB.
    return min(96 * 1024 * 1024, max(32 * 1024 * 1024, (phys * 3) // 4))


def _pick_row_tile(nc, hw, itemsize, budget):
    """Largest multiple-of-8 row tile dividing nc that fits the VMEM budget.

    Returns None if no valid tile fits (caller falls back to the XLA path).
    Accounts for double-buffered in + out, the in-kernel f32 intermediates
    (astype copy / pre-store expression), and the packed (R, 2) style block.
    """
    f32_tmp = 2 * hw * 4 if itemsize < 4 else hw * 4
    per_row = 4 * hw * itemsize + f32_tmp + 2 * 2 * 4
    max_rows_budget = budget // per_row
    if max_rows_budget < 8:
        return None
    if nc % 8 != 0:
        # No clean multiple-of-8 tiling; full-extent block only if it fits.
        return nc if nc <= max_rows_budget else None
    # Keep the grid at >= ~8 (even) steps so double-buffering overlaps DMAs
    # and both v7x TensorCores get work on the 'parallel' axis.
    target_steps = 8
    step_cap = max(8, ((nc // target_steps) // 8) * 8)
    max_rows = min((max_rows_budget // 8) * 8, step_cap)
    tile = min(nc, max_rows)
    while tile >= 8 and nc % tile != 0:
        tile -= 8
    return tile if tile >= 8 else None


def _adain_xla(x, scale, bias):
    """Fused pure-JAX fallback (HW < 128, ragged NC, or VMEM-infeasible blocks)."""
    xf = x.astype(jnp.float32)
    mean = jnp.mean(xf, axis=(2, 3), keepdims=True)
    var = jnp.mean(jnp.square(xf - mean), axis=(2, 3), keepdims=True)
    a = scale[:, :, None, None] * jax.lax.rsqrt(var + EPS)
    b = bias[:, :, None, None] - a * mean
    return (a * xf + b).astype(x.dtype)


def adain(x, w, scale_w, scale_b, bias_w, bias_b):
    """x: (N, C, H, W), w: (N, w_dim). Returns (N, C, H, W) in x.dtype."""
    N, C, H, W = x.shape
    HW = H * W
    NC = N * C

    # --- Hoisted + fused style linears: one (N, w_dim) x (w_dim, 2C) matmul.
    w32 = w.astype(jnp.float32)
    fw = jnp.concatenate([scale_w, bias_w], axis=0).astype(jnp.float32)   # (2C, w_dim)
    fb = jnp.concatenate([scale_b, bias_b], axis=0).astype(jnp.float32)   # (2C,)
    style = jnp.dot(w32, fw.T, preferred_element_type=jnp.float32) + fb   # (N, 2C)
    scale = style[:, :C]                                                  # (N, C)
    bias = style[:, C:]                                                   # (N, C)

    vmem_limit = _vmem_limit_bytes()
    tile_budget = (vmem_limit * 7) // 8  # small headroom under the limit

    row_tile = None
    if HW >= 128:
        row_tile = _pick_row_tile(NC, HW, x.dtype.itemsize, tile_budget)

    if row_tile is None:
        # Early tiny layers (lane-masked stores / per-step overhead dominate)
        # or blocks that cannot fit VMEM: use the fused XLA path.
        # TODO(synk): two-pass sum/sum-of-squares reduction over an HW grid
        # axis ('arbitrary') for very large spatial layers, esp. on v7x (64 MiB).
        return _adain_xla(x, scale, bias)

    # --- Lane-dense 2D layout for the kernel; packed per-row style operand.
    x2d = x.reshape(NC, HW)
    sb = jnp.stack([scale.reshape(NC), bias.reshape(NC)], axis=-1)        # (NC, 2) f32

    grid = (NC // row_tile,)
    out2d = pl.pallas_call(
        adain_kernel,
        out_shape=jax.ShapeDtypeStruct((NC, HW), x.dtype),
        grid=grid,
        in_specs=[
            pl.BlockSpec((row_tile, HW), lambda i: (i, 0)),   # x rows
            pl.BlockSpec((row_tile, 2), lambda i: (i, 0)),    # packed scale/bias
        ],
        out_specs=pl.BlockSpec((row_tile, HW), lambda i: (i, 0)),
        compiler_params=pltpu.CompilerParams(
            dimension_semantics=("parallel",),
            vmem_limit_bytes=vmem_limit,
        ),
    )(x2d, sb)

    return out2d.reshape(N, C, H, W)


def adain_reference(x, w, scale_w, scale_b, bias_w, bias_b):
    """Pure-JAX reference matching the PyTorch module (f32 math)."""
    xf = x.astype(jnp.float32)
    mean = jnp.mean(xf, axis=(2, 3), keepdims=True)
    var = jnp.mean((xf - mean) ** 2, axis=(2, 3), keepdims=True)
    x_norm = (xf - mean) / jnp.sqrt(var + EPS)
    wf = w.astype(jnp.float32)
    scale = wf @ scale_w.astype(jnp.float32).T + scale_b.astype(jnp.float32)
    bias = wf @ bias_w.astype(jnp.float32).T + bias_b.astype(jnp.float32)
    return scale[:, :, None, None] * x_norm + bias[:, :, None, None]


def _make_inputs(key, N, C, H, W, w_dim, dtype):
    k_x, k_w, k_sw, k_sb, k_bw, k_bb = jax.random.split(key, 6)
    x = jax.random.normal(k_x, (N, C, H, W), dtype=jnp.float32).astype(dtype)
    w = jax.random.normal(k_w, (N, w_dim), dtype=jnp.float32)
    bound = 1.0 / (w_dim ** 0.5)
    scale_w = jax.random.uniform(k_sw, (C, w_dim), jnp.float32, -bound, bound)
    scale_b = jax.random.uniform(k_sb, (C,), jnp.float32, -bound, bound)
    bias_w = jax.random.uniform(k_bw, (C, w_dim), jnp.float32, -bound, bound)
    bias_b = jax.random.uniform(k_bb, (C,), jnp.float32, -bound, bound)
    return x, w, scale_w, scale_b, bias_w, bias_b


if __name__ == "__main__":
    key = jax.random.PRNGKey(0)
    k1, k2 = jax.random.split(key)

    # --- Test 1: small f32 shape (grid of 1 block, Pallas path).
    args = _make_inputs(k1, N=2, C=4, H=16, W=16, w_dim=8, dtype=jnp.float32)
    out = adain(*args)
    jax.block_until_ready(out)
    ref = adain_reference(*args)
    assert out.shape == (2, 4, 16, 16)
    assert jnp.allclose(out, ref, atol=1e-4, rtol=1e-4), "f32 mismatch vs reference"

    # --- Test 2: bf16 input, multi-step grid (exercises tiling + f32 accum).
    args_bf = _make_inputs(k2, N=2, C=64, H=16, W=16, w_dim=8, dtype=jnp.bfloat16)
    out_bf = adain(*args_bf)
    jax.block_until_ready(out_bf)
    ref_bf = adain_reference(*args_bf)
    assert out_bf.shape == (2, 64, 16, 16)
    assert jnp.allclose(out_bf.astype(jnp.float32), ref_bf, atol=5e-2, rtol=5e-2), \
        "bf16 mismatch vs reference"

    print("KERNEL_OK")
</pallas_src>

<mosaic_0001>
module attributes {stable_mosaic.version = 11 : i64} {
  func.func @adain_kernel(%arg0: i32, %arg1: memref<8x256xf32, #tpu.memory_space<vmem>>, %arg2: memref<8x2xf32, #tpu.memory_space<vmem>>, %arg3: memref<8x256xf32, #tpu.memory_space<vmem>>) attributes {dimension_semantics = [#tpu.dimension_semantics<parallel>], iteration_bounds = array<i64: 1>, scalar_prefetch = 0 : i64, scratch_operands = 0 : i64, tpu.core_type = #tpu.core_type<tc>, window_params = [{transform_indices = @transform_0, window_bounds = array<i64: 8, 256>}, {transform_indices = @transform_1, window_bounds = array<i64: 8, 2>}, {transform_indices = @transform_2, window_bounds = array<i64: 8, 256>}]} {
    %c0 = arith.constant 0 : index
    %c0_0 = arith.constant 0 : index
    %0 = vector.load %arg1[%c0, %c0_0] : memref<8x256xf32, #tpu.memory_space<vmem>>, vector<8x256xf32>
    %c0_1 = arith.constant 0 : index
    %c0_2 = arith.constant 0 : index
    %1 = vector.load %arg2[%c0_1, %c0_2] : memref<8x2xf32, #tpu.memory_space<vmem>>, vector<8x2xf32>
    %2 = vector.extract_strided_slice %1 {offsets = [0, 0], sizes = [8, 1], strides = [1, 1]} : vector<8x2xf32> to vector<8x1xf32>
    %3 = vector.extract_strided_slice %1 {offsets = [0, 1], sizes = [8, 1], strides = [1, 1]} : vector<8x2xf32> to vector<8x1xf32>
    %cst = arith.constant dense<0.000000e+00> : vector<8xf32>
    %4 = vector.multi_reduction <add>, %0, %cst [1] : vector<8x256xf32> to vector<8xf32>
    %5 = vector.shape_cast %4 : vector<8xf32> to vector<8x1xf32>
    %cst_3 = arith.constant 2.560000e+02 : f32
    %6 = vector.broadcast %cst_3 : f32 to vector<8x1xf32>
    %7 = arith.divf %5, %6 : vector<8x1xf32>
    %8 = arith.mulf %0, %0 : vector<8x256xf32>
    %cst_4 = arith.constant dense<0.000000e+00> : vector<8xf32>
    %9 = vector.multi_reduction <add>, %8, %cst_4 [1] : vector<8x256xf32> to vector<8xf32>
    %10 = vector.shape_cast %9 : vector<8xf32> to vector<8x1xf32>
    %cst_5 = arith.constant 2.560000e+02 : f32
    %11 = vector.broadcast %cst_5 : f32 to vector<8x1xf32>
    %12 = arith.divf %10, %11 : vector<8x1xf32>
    %13 = arith.mulf %7, %7 : vector<8x1xf32>
    %14 = arith.subf %12, %13 : vector<8x1xf32>
    %cst_6 = arith.constant 0.000000e+00 : f32
    %15 = vector.broadcast %cst_6 : f32 to vector<8x1xf32>
    %16 = arith.maximumf %14, %15 : vector<8x1xf32>
    %cst_7 = arith.constant 9.99999974E-6 : f32
    %17 = vector.broadcast %cst_7 : f32 to vector<8x1xf32>
    %18 = arith.addf %16, %17 : vector<8x1xf32>
    %19 = math.rsqrt %18 : vector<8x1xf32>
    %20 = arith.mulf %2, %19 : vector<8x1xf32>
    %21 = arith.mulf %20, %7 : vector<8x1xf32>
    %22 = arith.subf %3, %21 : vector<8x1xf32>
    %23 = vector.broadcast %20 : vector<8x1xf32> to vector<8x256xf32>
    %24 = arith.mulf %23, %0 : vector<8x256xf32>
    %25 = vector.broadcast %22 : vector<8x1xf32> to vector<8x256xf32>
    %26 = arith.addf %24, %25 : vector<8x256xf32>
    %c0_8 = arith.constant 0 : index
    %c0_9 = arith.constant 0 : index
    %27 = vector.load %arg3[%c0_8, %c0_9] : memref<8x256xf32, #tpu.memory_space<vmem>>, vector<8x256xf32>
    tpu.vector_store %arg3[%c0_8, %c0_9], %26 {strides = array<i32>} : memref<8x256xf32, #tpu.memory_space<vmem>>, vector<8x256xf32>,
    return
  }
  func.func @transform_0(%arg0: i32) -> (i32, i32) {
    %c0_i32 = arith.constant 0 : i32
    %c0_i32_0 = arith.constant 0 : i32
    return %arg0, %c0_i32 : i32, i32
  }
  func.func @transform_1(%arg0: i32) -> (i32, i32) {
    %c0_i32 = arith.constant 0 : i32
    %c0_i32_0 = arith.constant 0 : i32
    return %arg0, %c0_i32 : i32, i32
  }
  func.func @transform_2(%arg0: i32) -> (i32, i32) {
    %c0_i32 = arith.constant 0 : i32
    %c0_i32_0 = arith.constant 0 : i32
    return %arg0, %c0_i32 : i32, i32
  }
}

</mosaic_0001>

<bundles_post_ra>
// kernel: tpu_custom_call.1
= control target key start
LH: loop header
LB: loop body
LE: loop exit
PB: predicated region body
PF: predicated region fallthrough
CT: control target
= control target key end

     0   :  { %7 = vsyncpa [#allocation3], 0  ;;  %s195_s0 = inlined_call_operand.hbm [shape: f32[8,256], index: 0, kind: input, shape index: {}]   ;;  %s196_s1 = inlined_call_operand.vmem [shape: f32[8,2], index: 1, kind: input, shape index: {}]   ;;  %s197_s2 = inlined_call_operand.hbm [shape: f32[8,256], index: 2, kind: output, shape index: {}]  }
   0x1   :  { %8 = vsyncpa [#allocation4], 0  ;;  %s14_s11 = sshll.u32 %s195_s0, 4  ;;  %s165_s12 = smov [#allocation2]   ;;  %s15_s11 = int_to_ptr.hbm [resolvable:$true] %s14_s11 }
   0x2   :  { %s16_s13 = sshll.u32 %s165_s12, 4  ;;  %s17_s13 = int_to_ptr.vmem [resolvable:$true] %s16_s13 }
   0x3   :  { %19 = dma.hbm_to_vmem [thread:$0]  %s15_s11, 256, %s17_s13, [#allocation3]  }
   0x4   :  { %161 = dma.done.wait [#allocation3], 256  }
   0x5   :  { %162 = vsyncadd [#allocation3], 4294967040  ;;  %v26_v0 = vld [vmem:[#allocation2] sm:$0xff]  ;;  %v27_v1 = vld [vmem:[#allocation2 + $0x8] sm:$0xff]  ;;  %v166_v6 = vmov 256.0   ;;  %v167_v16 = vmov 0  }
   0x6   :  { %v29_v2 = vadd.f32 %v27_v1, %v26_v0  ;;  %v40_v3 = vmul.f32 %v26_v0, %v26_v0  ;;  %v41_v4 = vmul.f32 %v27_v1, %v27_v1  ;;  %109 = vrcp.f32 %v166_v6  ;;  %106 = vset.pattern.permute.xlu1 %v167_v16  ;;  %v28_v27 = vld [vmem:[%s196_s1] sm:$0xff]  ;;  %s168_s15 = smov 1   ;;  %s170_s16 = smov [#allocation5]  }
   0x7   :  { %v169_v32 = vmov 1   ;;  %s88_s1 = sshll.u32 %s170_s16, 4  ;;  %s90_s19 = sshll.u32 %s197_s2, 4  ;;  %s89_s1 = int_to_ptr.vmem [resolvable:$true] %s88_s1  ;;  %s91_s19 = int_to_ptr.hbm [resolvable:$true] %s90_s19 }
   0x8   :  { %30 = vadd.xlane.f32.xlu0 %v29_v2  ;;  %v42_v5 = vadd.f32 %v41_v4, %v40_v3  ;;  %107 = vset.pattern.permute.xlu2 %v169_v32 }
   0x9   :  { %108 = vset.pattern.permute.xlu0 %v169_v32 }
   0xc   :  { %v110_v7 = vpop.eup %109 }
   0xd   :  { %v33_v8 = vmul.f32 256.0, %v110_v7  ;;  %vm37_vm0 = vweird.f32 %v110_v7 }
   0xf   :  { %v34_v9 = vsub.f32 1.0, %v33_v8 }
  0x10   :  { %43 = vadd.xlane.f32.xlu0 %v42_v5 }
  0x11   :  { %v35_v10 = vmul.f32 %v110_v7, %v34_v9 }
  0x13   :  { %v36_v11 = vadd.f32 %v110_v7, %v35_v10 }
  0x15   :  { %v38_v13 = vsel %vm37_vm0, %v110_v7, %v36_v11 }
  0x7b   :  { %v31_v12 = vpop.xlane.xlu0 %30 }
  0x7c   :  { %v39_v14 = vmul.f32 %v38_v13, %v31_v12 }
  0x7e   :  { %v46_v17 = vmul.f32 %v39_v14, %v39_v14 }
  0x83   :  { %v44_v15 = vpop.xlane.xlu0 %43 }
  0x84   :  { %v45_v18 = vmul.f32 %v44_v15, %v38_v13 }
  0x86   :  { %v47_v19 = vsub.f32 %v45_v18, %v46_v17 }
  0x88   :  { %v48_v20 = vmax.f32 %v47_v19, 0.0 }
  0x8a   :  { %v49_v21 = vadd.f32 1e-05, %v48_v20 }
  0x8c   :  { %111 = vrsqrt.f32 %v49_v21  ;;  %vm56_vm2 = vweird.f32 %v49_v21 }
  0x92   :  { %v112_v22 = vpop.eup %111 }
  0x93   :  { %v51_v23 = vmul.f32 %v112_v22, %v49_v21  ;;  %vm57_vm1 = vweird.f32 %v112_v22 }
  0x94   :  { %vm58_vm3 = vmor %vm56_vm2, %vm57_vm1 }
  0x95   :  { %v52_v24 = vmul.f32 %v112_v22, %v51_v23 }
  0x97   :  { %v53_v25 = vmul.f32 0.5, %v52_v24 }
  0x99   :  { %v54_v26 = vsub.f32 1.5, %v53_v25 }
  0x9b   :  { %v55_v28 = vmul.f32 %v112_v22, %v54_v26 }
  0x9d   :  { %v59_v29 = vsel %vm58_vm3, %v112_v22, %v55_v28 }
  0x9e   :  { %v60_v30 = vmul.f32 %v59_v29, %v28_v27 }
  0xa0   :  { %v61_v31 = vmul.f32 %v60_v30, %v39_v14 }
  0xa2   :  { %63 = vrot.lane.b32.xlu1 %v61_v31, %s168_s15 }
  0xaa   :  { %69 = vperm.xlu1 %106, %v60_v30  }
 0x114   :  { %v64_v33 = vpop.permute.xlu1 %63 }
 0x115   :  { %v66_v34 = vsub.f32 %v28_v27, %v64_v33 }
 0x117   :  { %76 = vperm.xlu2 %107, %v66_v34  }
 0x11c   :  { %v70_v35 = vpop.permute.xlu1 %69 }
 0x11d   :  { %v72_v36 = vmul.f32 %v70_v35, %v26_v0  ;;  %v73_v37 = vmul.f32 %v70_v35, %v27_v1 }
 0x171   :  { %v77_v38 = vpop.permute.xlu2 %76 }
 0x172   :  { %v79_v39 = vadd.f32 %v77_v38, %v72_v36  ;;  %v80_v40 = vadd.f32 %v77_v38, %v73_v37 }
 0x174   :  { %81 = vst [vmem:[#allocation5] sm:$0xff] %v79_v39 }
 0x175   :  { %82 = vst [vmem:[#allocation5 + $0x8] sm:$0xff] %v80_v40 }
 0x176   :  { %93 = dma.vmem_to_hbm [thread:$0]  %s89_s1, 256, %s91_s19, [#allocation4]  }
 0x177   :  { %163 = dma.done.wait [#allocation4], 256  }
 0x178   :  { %164 = vsyncadd [#allocation4], 4294967040 }
 0x179   :  { %98 = vsyncpa [#allocation3], 1 }
 0x17a   :  { %99 = vsyncpa [#allocation4], 1 }

</bundles_post_ra>
